<compile_context>
chip_gen: v6e
topology: v6e:2x2x1
jax: 0.10.0
libtpu: 0.0.40
codegen_flags: <defaults>
</compile_context>

<pallas_src>
import math

import jax
import jax.numpy as jnp
from jax import lax
from jax.experimental import pallas as pl
from jax.experimental.pallas import tpu as pltpu

# ----------------------- small synthetic config ----------------------------
BATCH = 2
SEQ = 16
HIDDEN = 32
NUM_CLASSES = 2  # fixed by the module: nn.Linear(2 * hidden, 2)


# ------------------------------ kernel -------------------------------------
def contact_head_kernel(x_ref, wp_ref, b_ref, out_ref):
    """One batch element of PairwiseContactPredictionHead (interior only).

    x_ref  : (1, S, H)             VMEM block - hidden states for this batch element
    wp_ref : (C, H)                VMEM       - weight half acting on the elementwise product
    b_ref  : (C,)                  SMEM       - bias scalars
    out_ref: (1, C*(S-2), S-2)     VMEM block - symmetric logits, channel-first slab
    """
    S = x_ref.shape[1]
    Si = S - 2

    x = x_ref[0]                # (S, H)  f32
    x_int = x[1:S - 1, :]       # (Si, H) interior rows only ([1:-1] folded into kernel)
    wp = wp_ref[...]            # (C, H)

    # Fused LHS for both classes: (C*Si, H). bf16 operands, f32 MXU accumulation.
    lhs = jnp.concatenate(
        [x_int * wp[0:1, :], x_int * wp[1:2, :]], axis=0).astype(jnp.bfloat16)
    rhs = x_int.astype(jnp.bfloat16)

    # Single MXU call, contracting on H (last dim of both -> no explicit transpose):
    #   a[c*Si + i, j] = sum_h x[i+1,h] * Wp[c,h] * x[j+1,h]
    a = lax.dot_general(lhs, rhs, (((1,), (1,)), ((), ())),
                        preferred_element_type=jnp.float32)          # (C*Si, Si)

    # Per-class bias over the stacked rows (rows [0,Si) -> class 0, [Si,2Si) -> class 1).
    row_is_c1 = lax.broadcasted_iota(jnp.int32, (NUM_CLASSES * Si, 1), 0) >= Si
    bias_col = jnp.where(row_is_c1, b_ref[1], b_ref[0])              # (C*Si, 1)

    # One lane-dense slab store (diff path & explicit symmetrisation cancel exactly).
    out_ref[0] = a + bias_col


# ------------------------------ wrapper -------------------------------------
def pairwise_contact_head(inputs, sequence_lengths, weight, bias):
    """inputs: (B, S, H) f32, weight: (2, 2H) torch Linear layout, bias: (2,).

    Returns (prediction,) with prediction of shape (B, S-2, S-2, 2), matching
    PairwiseContactPredictionHead.forward(inputs, sequence_lengths) in eval mode.
    """
    del sequence_lengths  # unused on the inference path (targets is None)
    B, S, H = inputs.shape
    C = weight.shape[0]
    Si = S - 2
    wp = weight[:, :H]  # product-half of the Linear; diff-half cancels under symmetrisation

    out = pl.pallas_call(
        contact_head_kernel,
        out_shape=jax.ShapeDtypeStruct((B, C * Si, Si), jnp.float32),
        grid_spec=pltpu.PrefetchScalarGridSpec(
            num_scalar_prefetch=0,
            grid=(B,),
            in_specs=[
                pl.BlockSpec((1, S, H), lambda b: (b, 0, 0)),
                pl.BlockSpec(memory_space=pltpu.MemorySpace.VMEM),   # Wp resident
                pl.BlockSpec(memory_space=pltpu.MemorySpace.SMEM),   # bias scalars
            ],
            out_specs=pl.BlockSpec((1, C * Si, Si), lambda b: (b, 0, 0)),
        ),
        compiler_params=pltpu.CompilerParams(
            dimension_semantics=("parallel",)),
    )(inputs, wp, bias)

    # Only a cheap channel reorder remains outside the kernel.
    prediction = jnp.transpose(out.reshape(B, C, Si, Si), (0, 2, 3, 1))
    return (prediction,)


# --------------------------- pure-JAX reference -----------------------------
def ref_forward(inputs, weight, bias):
    prod = inputs[:, :, None, :] * inputs[:, None, :, :]
    diff = inputs[:, :, None, :] - inputs[:, None, :, :]
    feats = jnp.concatenate([prod, diff], axis=-1)                   # (B,S,S,2H)
    pred = jnp.einsum("bijk,ck->bijc", feats, weight,
                      precision=lax.Precision.HIGHEST) + bias
    pred = 0.5 * (pred + jnp.swapaxes(pred, 1, 2))
    return pred[:, 1:-1, 1:-1, :]


# --------------------------------- main -------------------------------------
if __name__ == "__main__":
    root = jax.random.PRNGKey(0)
    k_x, k_w, k_b = jax.random.split(root, 3)

    inputs = jax.random.normal(k_x, (BATCH, SEQ, HIDDEN), jnp.float32)
    sequence_lengths = jnp.full((BATCH,), SEQ, jnp.int32)
    bound = 1.0 / math.sqrt(2 * HIDDEN)            # torch Linear default init range
    weight = jax.random.uniform(k_w, (NUM_CLASSES, 2 * HIDDEN), jnp.float32,
                                -bound, bound)
    bias = jax.random.uniform(k_b, (NUM_CLASSES,), jnp.float32, -bound, bound)

    (out,) = pairwise_contact_head(inputs, sequence_lengths, weight, bias)
    out = jax.block_until_ready(out)

    ref = jax.block_until_ready(ref_forward(inputs, weight, bias))

    assert out.shape == (BATCH, SEQ - 2, SEQ - 2, NUM_CLASSES), out.shape
    max_err = float(jnp.max(jnp.abs(out - ref)))
    assert jnp.allclose(out, ref, rtol=1e-2, atol=1e-2), f"max_err={max_err}"

    print("KERNEL_OK")
</pallas_src>

<mosaic_0001>
module attributes {stable_mosaic.version = 11 : i64} {
  func.func @contact_head_kernel(%arg0: i32, %arg1: memref<1x16x32xf32, #tpu.memory_space<vmem>>, %arg2: memref<2x32xf32, #tpu.memory_space<vmem>>, %arg3: memref<2xf32, #tpu.memory_space<smem>>, %arg4: memref<1x28x14xf32, #tpu.memory_space<vmem>>) attributes {dimension_semantics = [#tpu.dimension_semantics<parallel>], iteration_bounds = array<i64: 2>, scalar_prefetch = 0 : i64, scratch_operands = 0 : i64, tpu.core_type = #tpu.core_type<tc>, window_params = [{transform_indices = @transform_0, window_bounds = array<i64: 1, 16, 32>}, {pipeline_mode = #tpu.pipeline_mode<synchronous>, transform_indices = @transform_1, window_bounds = array<i64: 2, 32>}, {transform_indices = @transform_2, window_bounds = array<i64: 2>}, {transform_indices = @transform_3, window_bounds = array<i64: 1, 28, 14>}]} {
    %c0 = arith.constant 0 : index
    %c0_0 = arith.constant 0 : index
    %c0_1 = arith.constant 0 : index
    %0 = vector.load %arg1[%c0, %c0_0, %c0_1] : memref<1x16x32xf32, #tpu.memory_space<vmem>>, vector<1x16x32xf32>
    %1 = vector.shape_cast %0 : vector<1x16x32xf32> to vector<16x32xf32>
    %2 = vector.extract_strided_slice %1 {offsets = [1, 0], sizes = [14, 32], strides = [1, 1]} : vector<16x32xf32> to vector<14x32xf32>
    %c0_2 = arith.constant 0 : index
    %c0_3 = arith.constant 0 : index
    %3 = vector.load %arg2[%c0_2, %c0_3] : memref<2x32xf32, #tpu.memory_space<vmem>>, vector<2x32xf32>
    %4 = vector.extract_strided_slice %3 {offsets = [0, 0], sizes = [1, 32], strides = [1, 1]} : vector<2x32xf32> to vector<1x32xf32>
    %5 = vector.broadcast %4 : vector<1x32xf32> to vector<14x32xf32>
    %6 = arith.mulf %2, %5 : vector<14x32xf32>
    %7 = vector.extract_strided_slice %3 {offsets = [1, 0], sizes = [1, 32], strides = [1, 1]} : vector<2x32xf32> to vector<1x32xf32>
    %8 = vector.broadcast %7 : vector<1x32xf32> to vector<14x32xf32>
    %9 = arith.mulf %2, %8 : vector<14x32xf32>
    %10 = tpu.concatenate %6, %9 in 0 : vector<14x32xf32>, vector<14x32xf32> -> vector<28x32xf32>
    %11 = arith.truncf %10 : vector<28x32xf32> to vector<28x32xbf16>
    %12 = arith.truncf %2 : vector<14x32xf32> to vector<14x32xbf16>
    %cst = arith.constant dense<0.000000e+00> : vector<28x14xf32>
    %13 = tpu.matmul %11, %12, %cst {dimension_numbers = #tpu.dot_dimension_numbers<[1], [1], [0], [0], [0, 0, 1, 0], [], []>} : vector<28x32xbf16>, vector<14x32xbf16>, vector<28x14xf32> -> vector<28x14xf32>
    %14 = tpu.iota {dimensions = array<i32: 0>} : vector<28x1xi32>
    %c14_i32 = arith.constant 14 : i32
    %15 = vector.broadcast %c14_i32 : i32 to vector<28x1xi32>
    %16 = arith.cmpi sge, %14, %15 : vector<28x1xi32>
    %c1 = arith.constant 1 : index
    %17 = memref.load %arg3[%c1] : memref<2xf32, #tpu.memory_space<smem>>
    %c0_4 = arith.constant 0 : index
    %18 = memref.load %arg3[%c0_4] : memref<2xf32, #tpu.memory_space<smem>>
    %19 = vector.broadcast %17 : f32 to vector<28x1xf32>
    %20 = vector.broadcast %18 : f32 to vector<28x1xf32>
    %21 = arith.select %16, %19, %20 : vector<28x1xi1>, vector<28x1xf32>
    %22 = vector.broadcast %21 : vector<28x1xf32> to vector<28x14xf32>
    %23 = arith.addf %13, %22 : vector<28x14xf32>
    %c0_5 = arith.constant 0 : index
    %c0_6 = arith.constant 0 : index
    %c0_7 = arith.constant 0 : index
    %24 = vector.load %arg4[%c0_5, %c0_6, %c0_7] : memref<1x28x14xf32, #tpu.memory_space<vmem>>, vector<1x28x14xf32>
    %25 = vector.shape_cast %24 : vector<1x28x14xf32> to vector<28x14xf32>
    %26 = vector.shape_cast %23 : vector<28x14xf32> to vector<1x28x14xf32>
    tpu.vector_store %arg4[%c0_5, %c0_6, %c0_7], %26 {strides = array<i32>} : memref<1x28x14xf32, #tpu.memory_space<vmem>>, vector<1x28x14xf32>,
    return
  }
  func.func @transform_0(%arg0: i32) -> (i32, i32, i32) {
    %c0_i32 = arith.constant 0 : i32
    %c0_i32_0 = arith.constant 0 : i32
    %c0_i32_1 = arith.constant 0 : i32
    return %arg0, %c0_i32, %c0_i32_0 : i32, i32, i32
  }
  func.func @transform_1(%arg0: i32) -> (i32, i32) {
    %c0_i32 = arith.constant 0 : i32
    %c0_i32_0 = arith.constant 0 : i32
    %c0_i32_1 = arith.constant 0 : i32
    return %c0_i32, %c0_i32_0 : i32, i32
  }
  func.func @transform_2(%arg0: i32) -> i32 {
    %c0_i32 = arith.constant 0 : i32
    %c0_i32_0 = arith.constant 0 : i32
    return %c0_i32 : i32
  }
  func.func @transform_3(%arg0: i32) -> (i32, i32, i32) {
    %c0_i32 = arith.constant 0 : i32
    %c0_i32_0 = arith.constant 0 : i32
    %c0_i32_1 = arith.constant 0 : i32
    return %arg0, %c0_i32, %c0_i32_0 : i32, i32, i32
  }
}

</mosaic_0001>

<bundles_post_ra>
// kernel: tpu_custom_call.1
= control target key start
LH: loop header
LB: loop body
LE: loop exit
PB: predicated region body
PF: predicated region fallthrough
CT: control target
= control target key end

     0   :  { %8 = vsyncpa [#allocation3], 0  ;;  %s816_s0 = inlined_call_operand.hbm [shape: f32[2,16,32], index: 0, kind: input, shape index: {}]   ;;  %s817_s1 = inlined_call_operand.hbm [shape: f32[2,32], index: 1, kind: input, shape index: {}]   ;;  %s818_s2 = inlined_call_operand.vmem [shape: f32[2], index: 2, kind: input, shape index: {}]   ;;  %s819_s3 = inlined_call_operand.vmem [shape: f32[2,28,14], index: 3, kind: output, shape index: {}]  }
   0x1   :  { %10 = vsyncpa [#allocation3 + $0x1], 0 }
   0x2   :  { %11 = vsyncpa [#allocation6], 0 }
   0x3   :  { %12 = vsyncpa [#allocation4], 0  ;;  %s665_s12 = smov 0   ;;  %s667_s13 = smov 0  }
   0x4   :  { %s669_s14 = smov 0   ;;  %s671_s15 = smov 0  }
   0x5 LB: > { %s684_s16 = sadd.s32 4294967295, %s638_s15   ;;  %s687_s17 = sadd.s32 1, %s638_s15   ;;  %s638_s15 = sphi %s671_s15, %s839_s15   ;;  %s634_s14 = sphi %s669_s14, %s838_s14   ;;  %s630_s13 = sphi %s667_s13, %s837_s13   ;;  %s626_s12 = sphi %s665_s12, %s836_s12  }
   0x6   : > { %s22_s18 = ssub.s32 %s638_s15, %s687_s17  ;;  %s25_s19 = sadd.s32 1, %s634_s14 }
   0x7   : > { %p23_p0 = scmp.eq.s32.totalorder %s22_s18, 0  ;;  %p32_p1 = scmp.ne.s32.totalorder %s634_s14, %s630_s13 }
   0x8   : > { %p33_p2 = scmp.eq.s32.totalorder %s638_s15, 0  ;;  %p38_p3 = scmp.ne.s32.totalorder %s630_s13, %s626_s12 }
   0x9   : > { %s697_s20 = scalar_select %p23_p0, %s634_s14, %s25_s19  }
   0xa   : > { %p699_p4 = por %p33_p2, %p32_p1  ;;  %p820_p5 = scmp.eq.s32.totalorder %s684_s16, 0 }
   0xb   : > { %p435_p6 = scmp.ge.s32.totalorder %s638_s15, 1  ;;  %p117_p7 = scmp.lt.s32.totalorder %s638_s15, 3 }
   0xc   : > { %p708_p8 = por %p820_p5, %p38_p3  ;;  %s640_s24 = smov [#allocation5]  }
   0xd   : > { %p712_p9 = pnand %p435_p6, %p117_p7  ;;  %s130_s25 = sshll.u32 %s640_s24, 4  ;;  %s131_s25 = int_to_ptr.vmem [resolvable:$true] %s130_s25 }
   0xe   : > { %s825_s22 = scalar_select %p708_p8, 1, 0 }
   0xf   : > { %s826_s23 = scalar_select %p712_p9, 1, 0 }
  0x10   : > { %p475_p10 = pneg %p712_p9  ;;  %p488_p11 = scmp.lt.s32.totalorder %s638_s15, 2 }
  0x11   : > { %s141_s28 = sshll.u32 %s818_s2, 4  ;;  %s152_s4 = sand.u32 1, %s634_s14   ;;  %s142_s28 = int_to_ptr.vmem [resolvable:$true] %s141_s28 }
  0x12   : > { %p724_p12 = pnand %p475_p10, %p820_p5  ;;  %p730_p13 = pnand %p488_p11, %p699_p4 }
  0x13   : > { %s538_s5 = scalar_lea.vmem %s131_s25, 32  ;;  %p546_p6 = scmp.lt.s32.totalorder %s131_s25, %s131_s25 }
  0x14   : > { %s828_s30 = scalar_select %p730_p13, 1, 0 }
  0x15   : > { %p529_p0 = pneg %p724_p12  ;;  %p539_p1 = scmp.ne.s32.totalorder %s131_s25, %s538_s5 }
  0x16   : > { %p547_p7 = scmp.lt.s32.totalorder %s538_s5, %s538_s5 }
  0x17   : > { %p541_p2 = pnand %p539_p1, %p529_p0 }
  0x18   : > { %p548_p10 = por %p547_p7, %p546_p6 }
  0x19   : > { %p542_p3 = pneg %p541_p2 }
  0x1b   : > { %p549_p5 = pnand %p548_p10, %p542_p3 }
  0x1d   : > { %552 = shalt.err (!%p549_p5)
}
  0x1e   : > { %478 = dma.hbm_to_vmem [thread:$0]  (!%p724_p12), %s817_s1, 32, %s131_s25, [#allocation6]  }
  0x1f   : > { %s553_s8 = scalar_lea.vmem %s142_s28, 16  ;;  %p561_p1 = scmp.lt.s32.totalorder %s142_s28, %s142_s28 }
  0x20   : > { %p554_p4 = scmp.ne.s32.totalorder %s142_s28, %s553_s8  ;;  %p562_p2 = scmp.lt.s32.totalorder %s553_s8, %s553_s8 }
  0x22   : > { %p556_p11 = pnand %p554_p4, %p529_p0  ;;  %p563_p9 = por %p562_p2, %p561_p1 }
  0x24   : > { %p557_p8 = pneg %p556_p11 }
  0x26   : > { %p564_p13 = pnand %p563_p9, %p557_p8 }
  0x28   : > { %567 = shalt.err (!%p564_p13)
}
  0x29   : > { %s641_s9 = smov [#allocation7]   ;;  %s439_s10 = sshll.u32 %s152_s4, 4 }
  0x2a   : > { %481 = dma.vmem_to_smem (!%p724_p12), %s142_s28, 16, %s641_s9, [#allocation4]  }
  0x2b   : > { %s453_s11 = sshll.u32 %s638_s15, 8  ;;  %s156_s21 = scalar_lea.vmem [#allocation2], %s439_s10 }
  0x2c   : > { %s754_s19 = scalar_lea.hbm %s816_s0, %s453_s11  ;;  %s163_s24 = sshll.u32 %s156_s21, 4  ;;  %s756_s24 = int_to_ptr.vmem [resolvable:$true] %s163_s24 }
  0x2d   : > { %s758_s25 = scalar_lea.sflag [#allocation3], %s152_s4  ;;  %s568_s26 = scalar_lea.hbm %s754_s19, 256 }
  0x2e   : > { %p569_p5 = scmp.ne.s32.totalorder %s754_s19, %s568_s26  ;;  %p829_p8 = scmp.ne.s32.totalorder %s828_s30, 0 }
  0x2f   : > { %s573_s28 = scalar_lea.hbm %s816_s0, 512  ;;  %p574_p0 = scmp.lt.s32.totalorder %s754_s19, %s816_s0 }
  0x30   : > { %p570_p9 = pneg %p829_p8  ;;  %p575_p3 = scmp.lt.s32.totalorder %s573_s28, %s568_s26 }
  0x32   : > { %p571_p12 = pnand %p570_p9, %p569_p5  ;;  %p576_p6 = por %p575_p3, %p574_p0 }
  0x34   : > { %p572_p13 = pneg %p571_p12 }
  0x36   : > { %p577_p7 = pnand %p576_p6, %p572_p13 }
  0x38   : > { %580 = shalt.err (!%p577_p7)
}
  0x39   : > { %s581_s4 = scalar_lea.vmem %s756_s24, 256  ;;  %s642_s6 = smov [#allocation2]  }
  0x3a   : > { %p582_p10 = scmp.ne.s32.totalorder %s756_s24, %s581_s4  ;;  %s586_s7 = sshll.u32 %s642_s6, 4  ;;  %s587_s7 = int_to_ptr.vmem [resolvable:$false] %s586_s7 }
  0x3b   : > { %s588_s8 = scalar_lea.vmem %s587_s7, 512  ;;  %p589_p1 = scmp.lt.s32.totalorder %s756_s24, %s587_s7 }
  0x3c   : > { %p584_p4 = pnand %p582_p10, %p570_p9  ;;  %p590_p2 = scmp.lt.s32.totalorder %s588_s8, %s581_s4 }
  0x3e   : > { %p585_p11 = pneg %p584_p4  ;;  %p591_p5 = por %p590_p2, %p589_p1 }
  0x40   : > { %p592_p12 = pnand %p591_p5, %p585_p11 }
  0x42   : > { %595 = shalt.err (!%p592_p12)
}
  0x43   : > { %s643_s9 = smov 128   ;;  %s644_s10 = smov 8  }
  0x44   : > { %485 = dma.hbm_to_vmem [thread:$0]  (!%p829_p8), %s754_s19, 256, %s756_s24, %s758_s25, %s643_s9, %s643_s9, %s644_s10  }
  0x45   : > { %p830_p9 = scmp.ne.s32.totalorder %s826_s23, 0 }
  0x46   : > { %s177_s11 = sand.u32 (!%p830_p9), 1, %s630_s13   ;;  %p831_p13 = scmp.ne.s32.totalorder (!%p830_p9), %s825_s22, 0 }
  0x47   : > { %175 = sbr.rel (%p830_p9) target bundleno = 305 (0x131), region = 32  ;;  %s443_s12 = sshll.u32 (!%p830_p9), %s177_s11, 4 }
  0x48   : > { %s178_s18 = scalar_lea.sflag (!%p830_p9), [#allocation3], %s177_s11  ;;  %s181_s21 = scalar_lea.vmem (!%p830_p9), [#allocation2], %s443_s12 }
  0x4c   : > { %613 = dma.done.wait (%p831_p13), %s178_s18, 256  }
  0x4d   : > { %615 = vsyncadd (%p831_p13), %s178_s18, 4294967040  ;;  %p832_p0 = scmp.eq.s32.totalorder %s684_s16, 0 }
  0x4f   : > { %617 = dma.done.wait (%p832_p0), [#allocation6], 32   ;;  %p833_p3 = pmov %p832_p0 }
  0x50   : > { %p834_p8 = pmov %p832_p0 }
  0x51   : > { %619 = vsyncadd (%p833_p3), [#allocation6], 4294967264 }
  0x52   : > { %621 = dma.done.wait (%p834_p8), [#allocation4], 16   ;;  %p835_p6 = pmov %p832_p0 }
  0x54   : > { %623 = vsyncadd (%p835_p6), [#allocation4], 4294967280 }
  0x55   : > { %194 = sfence }
  0x56   : > { %v219_v0 = vld [vmem:[%s181_s21] sm:$0xff]  ;;  %v220_v1 = vld [vmem:[%s181_s21 + $0x8] sm:$0xff]  ;;  %v222_v2 = vlaneseq  ;;  %vm280_vm0 = vcmask 261120   ;;  %vm236_vm1 = vcmask 1046528   ;;  %vm251_vm2 = vcmask 1045504   ;;  %p213_p7 = scmp.lt.s32.totalorder %s684_s16, 1 }
  0x57   : > { %v255_v3 = vpack.c.bf16 %v220_v1, %v219_v0  ;;  %v221_v7 = vld [vmem:[#allocation5] sm:$0x3]  ;;  %vm244_vm3 = vcmask 1044480   ;;  %s448_s22 = sld [smem:[#allocation7 + $0x1]]  ;;  %vm339_vm4 = vcmask 113664   ;;  %vm343_vm6 = vcmask 109568  }
  0x58   : > { %v223_v4 = vshrl.u32 %v222_v2, 7  ;;  %s266_s23 = sld [smem:[#allocation7]]  ;;  %s841_s16 = smov (!%p213_p7, %s684_s16), 1 }
  0x59   : > { %v274_v5 = vshrl.u32 %v255_v3, 16  ;;  %v276_v6 = vshll.u32 %v255_v3, 16  ;;  %s454_s30 = sshll.u32 %s841_s16, 5 }
  0x5a   : > { %v224_v8 = vsub.s32 0, %v223_v4  ;;  %v230_v9 = vsub.s32 1, %v223_v4  ;;  %v258_v28 = vadd.s32 8, %v223_v4  ;;  %s217_s25 = scalar_lea.vmem %s819_s3, %s454_s30 }
  0x5b   : > { %v278_v10 = vrot.slane %v276_v6, 1 }
  0x5c   : > { %v225_v11 = vrot.slane %v221_v7, %v224_v8  ;;  %v231_v12 = vrot.slane %v221_v7, %v230_v9  ;;  %vm262_vm5 = vcmp.ge.s32.totalorder %v258_v28, 14 }
  0x5d   : > { %v279_v13 = vor.u32 %v278_v10, %v274_v5  ;;  %v267_v29 = vstv %s448_s22 }
  0x5e   : > { %v226_v14 = vmul.f32 %v225_v11, %v219_v0  ;;  %v227_v15 = vmul.f32 %v225_v11, %v220_v1  ;;  %v232_v16 = vmul.f32 %v231_v12, %v219_v0  ;;  %v233_v17 = vmul.f32 %v231_v12, %v220_v1 }
  0x5f   : > { %464 = vmatprep.subr.msk.bf16.mxu0 %vm280_vm0, %v279_v13  ;;  %v288_v18 = vsel %vm280_vm0, %v279_v13, 0  ;;  %v268_v31 = vstv %s266_s23 }
  0x60   : > { %459 = vmatpush3.bf16.xpose.msra.mxu0 %v288_v18  ;;  %v237_v19 = vrot.slane %v226_v14, 1  ;;  %v238_v20 = vrot.slane %v227_v15, 1  ;;  %v245_v21 = vrot.slane %v232_v16, 3  ;;  %v246_v22 = vrot.slane %v233_v17, 3 }
  0x61   : > { %v270_v36 = vsel %vm262_vm5, %v267_v29, %v268_v31 }
  0x62   : > { %v239_v23 = vsel %vm236_vm1, %v237_v19, %v238_v20  ;;  %v252_v24 = vsel %vm251_vm2, %v238_v20, %v245_v21  ;;  %v247_v25 = vsel %vm244_vm3, %v245_v21, %v246_v22 }
  0x63   : > { %v253_v26 = vpack.c.bf16 %v252_v24, %v239_v23  ;;  %v254_v27 = vpack.c.bf16 %v246_v22, %v247_v25 }
  0x65   : > { %460 = vmatprep.mubr.msk.bf16.mxu0 %vm280_vm0, %v253_v26 }
  0x67   : > { %461 = vmatmul.mubr.msk.bf16.vlgmr.msra.gmra.mxu0 %vm280_vm0, %v254_v27 }
 0x127   : > { %v462_v30 = vpop.f32.mrf.mxu0 }
 0x128   : > { %v333_v32 = vadd.f32 %v462_v30, %v267_v29 }
 0x129   : > { %v324_v33 = vpop.f32.mrf.mxu0 }
 0x12a   : > { %342 = vst.msk [vmem:[%s217_s25 + $0x10] sm:$0xff] %vm339_vm4, %v333_v32  ;;  %v325_v34 = vadd.f32 %v324_v33, %v268_v31 }
 0x12b   : > { %v463_v35 = vpop.f32.mrf.mxu0 }
 0x12c   : > { %340 = vst.msk [vmem:[%s217_s25] sm:$0xff] %vm339_vm4, %v325_v34  ;;  %v336_v37 = vadd.f32 %v463_v35, %v267_v29 }
 0x12d   : > { %v327_v38 = vpop.f32.mrf.mxu0 }
 0x12e   : > { %344 = vst.msk [vmem:[%s217_s25 + $0x18] sm:$0xf] %vm343_vm6, %v336_v37  ;;  %v328_v39 = vadd.f32 %v327_v38, %v270_v36 }
 0x130   : > { %341 = vst.msk [vmem:[%s217_s25 + $0x8] sm:$0xff] %vm339_vm4, %v328_v39 }
 0x131 PF: > { %p15_p10 = scmp.ge.s32.totalorder %s687_s17, 4   ;;  %s836_s12 = smov %s630_s13 }
 0x132   : > { %s837_s13 = smov %s634_s14  ;;  %s838_s14 = smov %s697_s20 }
 0x133   : > { %s839_s15 = smov %s687_s17  ;;  %17 = sbr.rel (!%p15_p10) target bundleno = 5 (0x5), region = 81 }
 0x138   :  { %366 = vsyncpa [#allocation3], 1 }
 0x139   :  { %368 = vsyncpa [#allocation3 + $0x1], 1 }
 0x13a   :  { %369 = vsyncpa [#allocation6], 1 }
 0x13b   :  { %370 = vsyncpa [#allocation4], 1 }
 0x13c   :  { %372 = vsyncpa [#allocation4 + $0x1], 1 }

</bundles_post_ra>
